<compile_context>
chip_gen: v7x
topology: tpu7x:2x2x1
jax: 0.10.0
libtpu: 0.0.40
codegen_flags: <defaults>
</compile_context>

<pallas_src>
import jax
import jax.numpy as jnp
import numpy as np
from jax.experimental import pallas as pl
from jax.experimental.pallas import tpu as pltpu

_LANE = 128           # lane width (last dim)
_SUBLANE_BF16 = 16    # bf16 sublane packing (second-to-last dim)


# ----------------------------- helpers -------------------------------------

def _round_up(a, b):
    return ((a + b - 1) // b) * b


def _pick_tile(dim, align, max_tile):
    """Largest multiple of `align` that divides round_up(dim, align), <= max_tile."""
    aligned = _round_up(dim, align)
    t = min(max_tile, aligned)
    t -= t % align
    t = max(t, align)
    while aligned % t:
        t -= align
    return t, aligned


def _max_tiles_for_generation():
    """Per-generation tile caps: v5e/v6e (128 MiB VMEM) vs v7x (64 MiB)."""
    try:
        vmem = pltpu.get_tpu_info().vmem_capacity_bytes
    except Exception:
        vmem = 64 * 1024 * 1024
    if vmem >= 100 * 1024 * 1024:
        return 512, 1024, 1024      # tm, tn, tk  (v5e / v6e)
    return 512, 512, 512            # v7x


# ----------------------------- Pallas kernel -------------------------------

def _make_linear_kernel(has_bias: bool, needs_scratch: bool):
    """Build a tiled (M, N, K)-grid matmul kernel body.

    Refs (in order): x (tm, tk) bf16, w (tk, tn) bf16, [bias (1, tn) f32],
    out (tm, tn), [acc scratch (tm, tn) f32 if output dtype != f32].
    """

    def kernel(*refs):
        if has_bias:
            x_ref, w_ref, b_ref, *rest = refs
        else:
            x_ref, w_ref, *rest = refs
            b_ref = None
        if needs_scratch:
            o_ref, acc_ref = rest
        else:
            (o_ref,) = rest
            acc_ref = o_ref           # f32 output: accumulate in place

        @pl.when(pl.program_id(2) == 0)
        def _():
            acc_ref[...] = jnp.zeros_like(acc_ref)

        # Weight is pre-transposed to (K, N): no in-kernel transpose, the MXU
        # consumes bf16 operands in their stored layout, f32 accumulation.
        acc_ref[...] += jnp.dot(
            x_ref[...], w_ref[...], preferred_element_type=jnp.float32
        )

        if has_bias or needs_scratch:
            @pl.when(pl.program_id(2) == pl.num_programs(2) - 1)
            def _():
                r = acc_ref[...]
                if has_bias:
                    r = r + b_ref[...].astype(jnp.float32)
                o_ref[...] = r.astype(o_ref.dtype)

    return kernel


def pallas_linear(x2d, w_t, bias2d, n_logical, out_dtype):
    """y = x2d @ w_t (+ bias) via a tiled (M, N, K) Pallas kernel.

    x2d:    (M, K)   activation (cast to bf16 here)
    w_t:    (Kp, Np) pre-transposed, pre-padded bf16 weight (from prepare step)
    bias2d: (1, Np) f32 or None
    n_logical: true out_features (<= Np) for the final slice
    """
    M, K = x2d.shape
    Kp, Np = w_t.shape
    assert Kp >= K and Kp % _LANE == 0 and Np % _LANE == 0

    max_tm, max_tn, max_tk = _max_tiles_for_generation()
    tm, Mp = _pick_tile(M, _SUBLANE_BF16, max_tm)
    tn, _ = _pick_tile(Np, _LANE, max_tn)
    tk, _ = _pick_tile(Kp, _LANE, max_tk)

    # v7x has 2 TensorCores sharing the "parallel" grid axes: try to expose
    # >=2 output tiles (no-op when the problem is too small to split).
    if (Mp // tm) * (Np // tn) < 2:
        if tn % 256 == 0 and Np % (tn // 2) == 0:
            tn //= 2
        elif tm % 32 == 0 and Mp % (tm // 2) == 0:
            tm //= 2

    # bf16 activations for the MXU; pad only when M/K are actually ragged
    # (typical large shapes have M % 16 == 0 and K % 128 == 0 -> no pad copy).
    xb = x2d.astype(jnp.bfloat16)
    if Mp != M or Kp != K:
        xb = jnp.pad(xb, ((0, Mp - M), (0, Kp - K)))

    has_bias = bias2d is not None
    needs_scratch = jnp.dtype(out_dtype) != jnp.dtype(jnp.float32)
    kernel = _make_linear_kernel(has_bias, needs_scratch)

    in_specs = [
        pl.BlockSpec((tm, tk), lambda i, j, k: (i, k)),   # x tile
        pl.BlockSpec((tk, tn), lambda i, j, k: (k, j)),   # W^T tile
    ]
    args = [xb, w_t]
    if has_bias:
        in_specs.append(pl.BlockSpec((1, tn), lambda i, j, k: (0, j)))
        args.append(bias2d)

    scratch = [pltpu.VMEM((tm, tn), jnp.float32)] if needs_scratch else []

    out_bytes = jnp.dtype(out_dtype).itemsize
    # VMEM footprint: double-buffered bf16 inputs + bias + output (+ f32 acc),
    # with ~50% headroom; clamp to [32 MiB default, 48 MiB] so we never ask
    # for v7x's entire 64 MiB nor cap v5e/v6e unnecessarily low.
    footprint = 2 * (tm * tk + tk * tn + tn) * 2 + 2 * tm * tn * out_bytes
    if needs_scratch:
        footprint += tm * tn * 4
    vmem_limit = int(min(max(footprint * 3 // 2, 32 * 1024 * 1024),
                         48 * 1024 * 1024))

    cost = pl.CostEstimate(
        flops=2 * Mp * Np * Kp,
        transcendentals=0,
        bytes_accessed=(Mp * Kp * 2 + Kp * Np * 2 + Mp * Np * out_bytes
                        + (Np * 4 if has_bias else 0)),
    )

    out = pl.pallas_call(
        kernel,
        out_shape=jax.ShapeDtypeStruct((Mp, Np), out_dtype),
        grid_spec=pltpu.PrefetchScalarGridSpec(
            num_scalar_prefetch=0,
            grid=(Mp // tm, Np // tn, Kp // tk),      # K innermost (reduction)
            in_specs=in_specs,
            out_specs=pl.BlockSpec((tm, tn), lambda i, j, k: (i, j)),
            scratch_shapes=scratch,
        ),
        compiler_params=pltpu.CompilerParams(
            dimension_semantics=("parallel", "parallel", "arbitrary"),
            vmem_limit_bytes=vmem_limit,
        ),
        cost_estimate=cost,
    )(*args)

    if Mp != M or Np != n_logical:
        out = out[:M, :n_logical]
    return out


# ------------------------- SASUT Linear forward -----------------------------

def prepare_sasut_weight(q_weight, fp_weight, inv_col_perm, bias=None):
    """One-time weight/bias prep (constant for inference, hoisted out of forward).

    hstack the q / fp column groups, undo the column permutation, transpose to
    (in_features, out_features) so N is lane-dense, cast to bf16 for the MXU,
    and zero-pad K/N up to multiples of 128.  Bias is cast to f32 and padded
    once as a (1, Np) row.
    """
    out_w = jnp.concatenate([q_weight, fp_weight], axis=1)    # (N, K)
    out_w = out_w[:, inv_col_perm]                             # undo column perm
    w_t = out_w.T.astype(jnp.bfloat16)                         # (K, N)
    K, N = w_t.shape
    Kp, Np = _round_up(K, _LANE), _round_up(N, _LANE)
    if (Kp, Np) != (K, N):
        w_t = jnp.pad(w_t, ((0, Kp - K), (0, Np - N)))
    bias2d = None
    if bias is not None:
        b = bias.astype(jnp.float32)
        if Np != N:
            b = jnp.pad(b, (0, Np - N))
        bias2d = b.reshape(1, Np)
    return w_t, bias2d, N


def sasut_linear_forward(x, w_t, bias2d, n_logical):
    """Eval-mode forward: y = x @ W^T + b with W^T pre-materialized as w_t."""
    lead = x.shape[:-1]
    K = x.shape[-1]
    x2d = x.reshape(-1, K)
    y2d = pallas_linear(x2d, w_t, bias2d, n_logical, out_dtype=x.dtype)
    return y2d.reshape(*lead, n_logical)


# --------------------------------- main -------------------------------------

if __name__ == "__main__":
    batch, seq = 2, 8
    in_features, out_features = 32, 32
    outlier_num = 4
    dtype = jnp.float32

    # outlier column ids (deterministic)
    outlier_ids = np.array([1, 7, 13, 30], dtype=np.int32)
    assert outlier_ids.size == outlier_num

    # mask / col_perm / inv_col_perm exactly as SASUTLayer.set_mask
    mask = np.ones(in_features, dtype=bool)
    mask[outlier_ids] = False
    col_ids = np.arange(in_features, dtype=np.int32)
    col_perm = np.concatenate([col_ids[mask], col_ids[~mask]])
    inv_col_perm = np.zeros_like(col_perm)
    inv_col_perm[col_perm] = np.arange(col_perm.size, dtype=np.int32)

    q_in_features = in_features - outlier_num
    fp_in_features = outlier_num

    # Deterministic parameter / input init
    key = jax.random.PRNGKey(0)
    k_w, k_b, k_x = jax.random.split(key, 3)
    base_weight = jax.random.normal(k_w, (out_features, in_features), dtype=dtype) * 0.1
    bias = jax.random.normal(k_b, (out_features,), dtype=dtype) * 0.1
    x = jax.random.normal(k_x, (batch, seq, in_features), dtype=dtype)

    # from_fp_Linear: split base weight into q / fp column groups
    sasut_q_weight = base_weight[:, np.asarray(mask)]           # (N, q_in_features)
    sasut_fp_weight = base_weight[:, np.asarray(~mask)]         # (N, fp_in_features)
    assert sasut_q_weight.shape == (out_features, q_in_features)
    assert sasut_fp_weight.shape == (out_features, fp_in_features)

    inv_col_perm_j = jnp.asarray(inv_col_perm)

    # One-time weight/bias prep (constant for inference), then Pallas forward.
    w_t, bias2d, n_logical = prepare_sasut_weight(
        sasut_q_weight, sasut_fp_weight, inv_col_perm_j, bias
    )
    w_t = jax.block_until_ready(w_t)

    y = sasut_linear_forward(x, w_t, bias2d, n_logical)
    y = jax.block_until_ready(y)

    # Reference 1: same numerics (bf16 operands, f32 accumulation) — tight.
    y_ref_bf16 = (
        jnp.einsum(
            "bsi,oi->bso",
            x.astype(jnp.bfloat16),
            base_weight.astype(jnp.bfloat16),
            preferred_element_type=jnp.float32,
        )
        + bias.astype(jnp.float32)
    )
    np.testing.assert_allclose(
        np.asarray(y), np.asarray(y_ref_bf16), rtol=1e-4, atol=1e-4
    )

    # Reference 2: full-precision semantics of the PyTorch module — loose
    # tolerance to absorb the bf16 operand cast.
    y_ref_f32 = jnp.einsum("bsi,oi->bso", x, base_weight) + bias
    np.testing.assert_allclose(
        np.asarray(y), np.asarray(y_ref_f32), rtol=3e-2, atol=3e-2
    )

    print("KERNEL_OK")
</pallas_src>

<mosaic_0001>
module attributes {stable_mosaic.version = 11 : i64} {
  func.func @kernel(%arg0: i32, %arg1: i32, %arg2: i32, %arg3: memref<16x128xbf16, #tpu.memory_space<vmem>>, %arg4: memref<128x128xbf16, #tpu.memory_space<vmem>>, %arg5: memref<1x128xf32, #tpu.memory_space<vmem>>, %arg6: memref<16x128xf32, #tpu.memory_space<vmem>>) attributes {dimension_semantics = [#tpu.dimension_semantics<parallel>, #tpu.dimension_semantics<parallel>, #tpu.dimension_semantics<arbitrary>], iteration_bounds = array<i64: 1, 1, 1>, scalar_prefetch = 0 : i64, scratch_operands = 0 : i64, tpu.core_type = #tpu.core_type<tc>, window_params = [{transform_indices = @transform_0, window_bounds = array<i64: 16, 128>}, {transform_indices = @transform_1, window_bounds = array<i64: 128, 128>}, {transform_indices = @transform_2, window_bounds = array<i64: 1, 128>}, {transform_indices = @transform_3, window_bounds = array<i64: 16, 128>}]} {
    %c0_i32 = arith.constant 0 : i32
    %0 = arith.cmpi eq, %arg2, %c0_i32 : i32
    %1 = arith.extui %0 : i1 to i32
    %c0_i32_0 = arith.constant 0 : i32
    %2 = arith.cmpi ne, %1, %c0_i32_0 : i32
    scf.if %2 {
      %cst_10 = arith.constant 0.000000e+00 : f32
      %12 = vector.broadcast %cst_10 : f32 to vector<16x128xf32>
      %c0_11 = arith.constant 0 : index
      %c0_12 = arith.constant 0 : index
      %13 = vector.load %arg6[%c0_11, %c0_12] : memref<16x128xf32, #tpu.memory_space<vmem>>, vector<16x128xf32>
      tpu.vector_store %arg6[%c0_11, %c0_12], %12 {strides = array<i32>} : memref<16x128xf32, #tpu.memory_space<vmem>>, vector<16x128xf32>,
    } else {
    }
    %c0 = arith.constant 0 : index
    %c0_1 = arith.constant 0 : index
    %3 = vector.load %arg6[%c0, %c0_1] : memref<16x128xf32, #tpu.memory_space<vmem>>, vector<16x128xf32>
    %c0_2 = arith.constant 0 : index
    %c0_3 = arith.constant 0 : index
    %4 = vector.load %arg3[%c0_2, %c0_3] : memref<16x128xbf16, #tpu.memory_space<vmem>>, vector<16x128xbf16>
    %c0_4 = arith.constant 0 : index
    %c0_5 = arith.constant 0 : index
    %5 = vector.load %arg4[%c0_4, %c0_5] : memref<128x128xbf16, #tpu.memory_space<vmem>>, vector<128x128xbf16>
    %cst = arith.constant dense<0.000000e+00> : vector<16x128xf32>
    %6 = tpu.matmul %4, %5, %cst {dimension_numbers = #tpu.dot_dimension_numbers<[1], [0], [0], [1], [0, 0, 1, 1], [], []>} : vector<16x128xbf16>, vector<128x128xbf16>, vector<16x128xf32> -> vector<16x128xf32>
    %7 = arith.addf %3, %6 : vector<16x128xf32>
    %c0_6 = arith.constant 0 : index
    %c0_7 = arith.constant 0 : index
    %8 = vector.load %arg6[%c0_6, %c0_7] : memref<16x128xf32, #tpu.memory_space<vmem>>, vector<16x128xf32>
    tpu.vector_store %arg6[%c0_6, %c0_7], %7 {strides = array<i32>} : memref<16x128xf32, #tpu.memory_space<vmem>>, vector<16x128xf32>,
    %c0_i32_8 = arith.constant 0 : i32
    %9 = arith.cmpi eq, %arg2, %c0_i32_8 : i32
    %10 = arith.extui %9 : i1 to i32
    %c0_i32_9 = arith.constant 0 : i32
    %11 = arith.cmpi ne, %10, %c0_i32_9 : i32
    scf.if %11 {
      %c0_10 = arith.constant 0 : index
      %c0_11 = arith.constant 0 : index
      %12 = vector.load %arg6[%c0_10, %c0_11] : memref<16x128xf32, #tpu.memory_space<vmem>>, vector<16x128xf32>
      %c0_12 = arith.constant 0 : index
      %c0_13 = arith.constant 0 : index
      %13 = vector.load %arg5[%c0_12, %c0_13] : memref<1x128xf32, #tpu.memory_space<vmem>>, vector<1x128xf32>
      %14 = vector.broadcast %13 : vector<1x128xf32> to vector<16x128xf32>
      %15 = arith.addf %12, %14 : vector<16x128xf32>
      %c0_14 = arith.constant 0 : index
      %c0_15 = arith.constant 0 : index
      %16 = vector.load %arg6[%c0_14, %c0_15] : memref<16x128xf32, #tpu.memory_space<vmem>>, vector<16x128xf32>
      tpu.vector_store %arg6[%c0_14, %c0_15], %15 {strides = array<i32>} : memref<16x128xf32, #tpu.memory_space<vmem>>, vector<16x128xf32>,
    } else {
    }
    return
  }
  func.func @transform_0(%arg0: i32, %arg1: i32, %arg2: i32) -> (i32, i32) {
    %c0_i32 = arith.constant 0 : i32
    return %arg0, %arg2 : i32, i32
  }
  func.func @transform_1(%arg0: i32, %arg1: i32, %arg2: i32) -> (i32, i32) {
    %c0_i32 = arith.constant 0 : i32
    return %arg2, %arg1 : i32, i32
  }
  func.func @transform_2(%arg0: i32, %arg1: i32, %arg2: i32) -> (i32, i32) {
    %c0_i32 = arith.constant 0 : i32
    %c0_i32_0 = arith.constant 0 : i32
    return %c0_i32, %arg1 : i32, i32
  }
  func.func @transform_3(%arg0: i32, %arg1: i32, %arg2: i32) -> (i32, i32) {
    %c0_i32 = arith.constant 0 : i32
    return %arg0, %arg1 : i32, i32
  }
}

</mosaic_0001>

<bundles_post_ra>
// kernel: tpu_custom_call.1
= control target key start
LH: loop header
LB: loop body
LE: loop exit
PB: predicated region body
PF: predicated region fallthrough
CT: control target
= control target key end

     0   :  { %8 = vsyncpa [#allocation3], 0  ;;  %s400_s0 = inlined_call_operand.hbm [shape: bf16[16,128], index: 0, kind: input, shape index: {}]   ;;  %s401_s1 = inlined_call_operand.hbm [shape: bf16[128,128], index: 1, kind: input, shape index: {}]   ;;  %s402_s2 = inlined_call_operand.vmem [shape: f32[1,128], index: 2, kind: input, shape index: {}]   ;;  %s403_s3 = inlined_call_operand.hbm [shape: f32[16,128], index: 3, kind: output, shape index: {}]  }
   0x1   :  { %9 = vsyncpa [#allocation6], 0 }
   0x2   :  { %10 = vsyncpa [#allocation4], 0  ;;  %s332_s12 = smov [#allocation2]   ;;  %s260_s16 = scalar_lea.hbm %s400_s0, 128 }
   0x3   :  { %s16_s13 = sshll.u32 %s332_s12, 4  ;;  %p261_p0 = scmp.ne.s32.totalorder %s400_s0, %s260_s16  ;;  %s17_s13 = int_to_ptr.vmem [resolvable:$true] %s16_s13 }
   0x4   :  { %p264_p1 = scmp.lt.u32.totalorder %s260_s16, %s400_s0 }
   0x6   :  { %p266_p2 = pnand %p264_p1, %p261_p0 }
   0x8   :  { %269 = shalt.err (!%p266_p2)
}
   0x9   :  { %s270_s21 = scalar_lea.vmem %s17_s13, 128  ;;  %p275_p4 = scmp.lt.s32.totalorder %s17_s13, %s17_s13 }
   0xa   :  { %p271_p3 = scmp.ne.s32.totalorder %s17_s13, %s270_s21  ;;  %p276_p5 = scmp.lt.s32.totalorder %s270_s21, %s270_s21 }
   0xc   :  { %p277_p6 = por %p276_p5, %p275_p4 }
   0xe   :  { %p278_p7 = pnand %p277_p6, %p271_p3 }
  0x10   :  { %281 = shalt.err (!%p278_p7)
}
  0x11   :  { %s333_s22 = smov 64   ;;  %s334_s23 = smov 4  }
  0x12   :  { %22 = dma.hbm_to_vmem [thread:$0]  %s400_s0, 128, %s17_s13, [#allocation3], %s333_s22, %s333_s22, %s334_s23  }
  0x13   :  { %s335_s26 = smov [#allocation5]   ;;  %s282_s30 = scalar_lea.hbm %s401_s1, 1024 }
  0x14   :  { %s28_s27 = sshll.u32 %s335_s26, 4  ;;  %p283_p8 = scmp.ne.s32.totalorder %s401_s1, %s282_s30  ;;  %s29_s27 = int_to_ptr.vmem [resolvable:$true] %s28_s27 }
  0x15   :  { %p286_p9 = scmp.lt.u32.totalorder %s282_s30, %s401_s1 }
  0x17   :  { %p288_p10 = pnand %p286_p9, %p283_p8 }
  0x19   :  { %291 = shalt.err (!%p288_p10)
}
  0x1a   :  { %s292_s8 = scalar_lea.vmem %s29_s27, 1024  ;;  %p297_p12 = scmp.lt.s32.totalorder %s29_s27, %s29_s27 }
  0x1b   :  { %p293_p11 = scmp.ne.s32.totalorder %s29_s27, %s292_s8  ;;  %p298_p13 = scmp.lt.s32.totalorder %s292_s8, %s292_s8 }
  0x1d   :  { %p299_p0 = por %p298_p13, %p297_p12 }
  0x1f   :  { %p300_p1 = pnand %p299_p0, %p293_p11 }
  0x21   :  { %303 = shalt.err (!%p300_p1)
}
  0x22   :  { %34 = dma.hbm_to_vmem [thread:$0]  %s401_s1, 1024, %s29_s27, [#allocation6], %s333_s22, %s333_s22, %s334_s23  }
  0x23   :  { %326 = dma.done.wait [#allocation3], 128  }
  0x24   :  { %327 = vsyncadd [#allocation3], 4294967168 }
  0x25   :  { %328 = dma.done.wait [#allocation6], 1024  }
  0x26   :  { %329 = vsyncadd [#allocation6], 4294966272  ;;  %v336_v0 = vmov 0.0   ;;  %vm337_vm0 = vmmov 0   ;;  %v251_v1 = vld [vmem:[#allocation5] sm:$0xff]   ;;  %v252_v2 = vld [vmem:[#allocation5 + $0x8] sm:$0xff]  }
  0x27   :  { %222 = vmatprep.subr.bf16.mxu0 %v336_v0  ;;  %238 = vmatprep.mubr.msk.bf16.mxu0 %vm337_vm0, %v336_v0  ;;  %v253_v3 = vld [vmem:[#allocation5 + $0x10] sm:$0xff]   ;;  %v254_v4 = vld [vmem:[#allocation5 + $0x18] sm:$0xff]   ;;  %v255_v5 = vld [vmem:[#allocation5 + $0x20] sm:$0xff]   ;;  %s338_s11 = smov [#allocation7]  }
  0x28   :  { %223 = vmatpush3.bf16.msra.mxu0 %v251_v1  ;;  %v256_v6 = vld [vmem:[#allocation5 + $0x28] sm:$0xff]   ;;  %v257_v7 = vld [vmem:[#allocation5 + $0x30] sm:$0xff]   ;;  %v258_v8 = vld [vmem:[#allocation5 + $0x38] sm:$0xff]   ;;  %s190_s12 = sshll.u32 %s338_s11, 4  ;;  %s191_s12 = int_to_ptr.vmem [resolvable:$true] %s190_s12 }
  0x29   :  { %224 = vmatprep.subr.bf16.mxu0 %v336_v0  ;;  %v259_v9 = vld [vmem:[#allocation2] sm:$0xff]   ;;  %s304_s13 = scalar_lea.vmem %s191_s12, 256  ;;  %p309_p3 = scmp.lt.s32.totalorder %s191_s12, %s191_s12 }
  0x2a   :  { %v212_v11 = vld [vmem:[%s402_s2] ss:$0 sm:$0xff]  ;;  %p305_p2 = scmp.ne.s32.totalorder %s191_s12, %s304_s13  ;;  %p310_p4 = scmp.lt.s32.totalorder %s304_s13, %s304_s13 }
  0x2c   :  { %225 = vmatpush3.bf16.msra.mxu0 %v252_v2  ;;  %p311_p5 = por %p310_p4, %p309_p3 }
  0x2d   :  { %226 = vmatprep.subr.bf16.mxu0 %v336_v0 }
  0x2e   :  { %p312_p6 = pnand %p311_p5, %p305_p2 }
  0x30   :  { %227 = vmatpush3.bf16.msra.mxu0 %v253_v3 }
  0x31   :  { %228 = vmatprep.subr.bf16.mxu0 %v336_v0 }
  0x34   :  { %229 = vmatpush3.bf16.msra.mxu0 %v254_v4 }
  0x35   :  { %230 = vmatprep.subr.bf16.mxu0 %v336_v0 }
  0x38   :  { %231 = vmatpush3.bf16.msra.mxu0 %v255_v5 }
  0x39   :  { %232 = vmatprep.subr.bf16.mxu0 %v336_v0 }
  0x3c   :  { %233 = vmatpush3.bf16.msra.mxu0 %v256_v6 }
  0x3d   :  { %234 = vmatprep.subr.bf16.mxu0 %v336_v0 }
  0x40   :  { %235 = vmatpush3.bf16.msra.mxu0 %v257_v7 }
  0x41   :  { %236 = vmatprep.subr.bf16.mxu0 %v336_v0 }
  0x44   :  { %237 = vmatpush3.bf16.msra.mxu0 %v258_v8 }
  0x47   :  { %239 = vmatmul.mubr.bf16.vlgmr.msra.gmra.mrb[0].mxu0 %v259_v9 }
 0x11a   :  { %v158_v10 = vpop.f32.mrb[0].mxu0 }
 0x11b   :  { %v240_v12 = vpop.f32.mrb[1].mxu0  ;;  %v181_v15 = vadd.f32 %v212_v11, %v158_v10 }
 0x11c   :  { %v161_v13 = vpop.f32.mrb[2].mxu0 }
 0x11d   :  { %v241_v14 = vpop.f32.mrb[3].mxu0  ;;  %v182_v16 = vadd.f32 %v212_v11, %v161_v13  ;;  %183 = vst [vmem:[#allocation7] sm:$0xff] %v181_v15 }
 0x11f   :  { %184 = vst [vmem:[#allocation7 + $0x8] sm:$0xff] %v182_v16 }
 0x120   :  { %315 = shalt.err (!%p312_p6)
}
 0x121   :  { %s316_s2 = scalar_lea.hbm %s403_s3, 256 }
 0x122   :  { %p317_p7 = scmp.ne.s32.totalorder %s403_s3, %s316_s2  ;;  %p320_p8 = scmp.lt.u32.totalorder %s316_s2, %s403_s3 }
 0x124   :  { %p322_p9 = pnand %p320_p8, %p317_p7 }
 0x126   :  { %325 = shalt.err (!%p322_p9)
}
 0x127   :  { %s339_s20 = smov 128   ;;  %s340_s21 = smov 8  }
 0x128   :  { %196 = dma.vmem_to_hbm [thread:$0]  %s191_s12, 256, %s403_s3, [#allocation4], %s339_s20, %s339_s20, %s340_s21  }
 0x129   :  { %330 = dma.done.wait [#allocation4], 256  }
 0x12a   :  { %331 = vsyncadd [#allocation4], 4294967040 }
 0x12b   :  { %200 = vsyncpa [#allocation3], 1 }
 0x12c   :  { %201 = vsyncpa [#allocation6], 1 }
 0x12d   :  { %202 = vsyncpa [#allocation4], 1 }

</bundles_post_ra>
